<compile_context>
chip_gen: v7x
topology: tpu7x:2x2x1
jax: 0.10.0
libtpu: 0.0.40
codegen_flags: <defaults>
</compile_context>

<pallas_src>
import functools

import jax
import jax.numpy as jnp
from jax import lax
from jax.experimental import pallas as pl
from jax.experimental.pallas import tpu as pltpu

KEY_OUTPUT = "metric_depth"

LANES = 128
SUBLANES = 8
TM_MAX = 4096            # rows per grid step (multiple of 32 -> valid for f32/bf16/int8 blocks)
NCORE = 2                # leading "parallel" grid axis -> both TensorCores on v7x
VMEM_LIMIT_BYTES = 32 * 1024 * 1024


def _round_up(x, m):
    return (x + m - 1) // m * m


def _fold_to_vreg(v, tm):
    """(tm, 128) f32 -> (8, 128): vreg-group fold (pure VALU adds, no XLU)."""
    return v.reshape(tm // SUBLANES, SUBLANES, LANES).sum(axis=0)


def _tail_valid(g, tm, n):
    """Element validity of the current block vs the true element count n.

    Only evaluated on tail blocks; covers lane padding, block padding and the
    clamped overflow re-reads of the last core.  int32 index math is fine for
    n < 2**31 elements (depth maps are far below that).
    """
    row = lax.broadcasted_iota(jnp.int32, (tm, LANES), 0)
    lane = lax.broadcasted_iota(jnp.int32, (tm, LANES), 1)
    gidx = (g * tm + row) * LANES + lane
    return gidx < n


def _rmse_masked_kernel(x_ref, t_ref, m_ref, osq_ref, oct_ref, *,
                        tm, steps_per_core, tail_block, n):
    c = pl.program_id(0)          # core / parallel axis
    i = pl.program_id(1)          # reduction steps within this core
    g = c * steps_per_core + i    # un-clamped global block index

    @pl.when(i == 0)
    def _():
        osq_ref[...] = jnp.zeros_like(osq_ref)
        oct_ref[...] = jnp.zeros_like(oct_ref)

    x = x_ref[...].astype(jnp.float32)
    t = t_ref[...].astype(jnp.float32)
    d = x - t
    keep = m_ref[...] != 0        # int8 -> bool directly, no f32 upcast

    is_tail = g >= tail_block

    @pl.when(jnp.logical_not(is_tail))
    def _():
        # Steady state: every element of the block is in-bounds; no iota mask.
        osq_ref[...] += _fold_to_vreg(jnp.where(keep, d * d, 0.0), tm)[None]
        oct_ref[...] += _fold_to_vreg(keep.astype(jnp.float32), tm)[None]

    @pl.when(is_tail)
    def _():
        k = keep & _tail_valid(g, tm, n)
        osq_ref[...] += _fold_to_vreg(jnp.where(k, d * d, 0.0), tm)[None]
        # f32 count stays exact here: each of the 1024 accumulator slots would
        # need > 2^24 hits (~17e9 total pixels) before losing integer exactness.
        oct_ref[...] += _fold_to_vreg(k.astype(jnp.float32), tm)[None]


def _rmse_nomask_kernel(x_ref, t_ref, osq_ref, *,
                        tm, steps_per_core, tail_block, n):
    c = pl.program_id(0)
    i = pl.program_id(1)
    g = c * steps_per_core + i

    @pl.when(i == 0)
    def _():
        osq_ref[...] = jnp.zeros_like(osq_ref)

    x = x_ref[...].astype(jnp.float32)
    t = t_ref[...].astype(jnp.float32)
    d = x - t

    is_tail = g >= tail_block

    @pl.when(jnp.logical_not(is_tail))
    def _():
        osq_ref[...] += _fold_to_vreg(d * d, tm)[None]

    @pl.when(is_tail)
    def _():
        valid = _tail_valid(g, tm, n)
        osq_ref[...] += _fold_to_vreg(jnp.where(valid, d * d, 0.0), tm)[None]


def rmse_loss(pred, target, mask=None, interpolate=True):
    """RMSE loss. pred/target: any matching shape (e.g. (B,1,H,W)). mask: bool or None."""
    if isinstance(pred, dict):
        pred = pred[KEY_OUTPUT]

    x = jnp.asarray(pred).reshape(-1)
    t = jnp.asarray(target).reshape(-1)
    if x.shape[0] != t.shape[0]:
        raise ValueError("pred/target element counts must match (no in-kernel resize)")
    n_true = x.shape[0]
    if n_true == 0:
        return jnp.float32(jnp.nan)   # mean over empty, matches torch

    # Lane alignment: typical depth maps (H*W multiple of 128) take the no-copy
    # path; otherwise one padded copy is emitted just to make the (rows, 128)
    # reshape legal (padded elements are masked in-kernel anyway).
    pad = (-n_true) % LANES
    if pad:
        x = jnp.pad(x, (0, pad))
        t = jnp.pad(t, (0, pad))
    rows = x.shape[0] // LANES
    x = x.reshape(rows, LANES)
    t = t.reshape(rows, LANES)

    # Tile geometry: (tm, 128) blocks, rows split over NCORE cores on the
    # leading "parallel" grid axis; the reduction axis stays "arbitrary".
    tm = min(TM_MAX, _round_up(pl.cdiv(rows, NCORE), 32))  # mult of 32: int8 mask pack
    total_blocks = pl.cdiv(rows, tm)
    steps_per_core = pl.cdiv(total_blocks, NCORE)
    last_block = total_blocks - 1
    grid = (NCORE, steps_per_core)

    def in_map(c, i):
        # Clamp the last core's overflow steps onto the last real block; the
        # in-kernel validity test zeroes their contribution.
        return (jnp.minimum(c * steps_per_core + i, last_block), 0)

    f_spec = pl.BlockSpec((tm, LANES), in_map)
    acc_shape = jax.ShapeDtypeStruct((NCORE, SUBLANES, LANES), jnp.float32)
    acc_spec = pl.BlockSpec((1, SUBLANES, LANES), lambda c, i: (c, 0, 0))
    cparams = pltpu.CompilerParams(
        dimension_semantics=("parallel", "arbitrary"),
        vmem_limit_bytes=VMEM_LIMIT_BYTES,
    )

    if mask is not None:
        m = jnp.asarray(mask).reshape(-1)
        if m.dtype == jnp.bool_:
            m = m.astype(jnp.int8)
        elif m.dtype != jnp.int8:
            m = (m != 0).astype(jnp.int8)
        if pad:
            m = jnp.pad(m, (0, pad))   # padded pixels masked out (also covered by validity)
        m = m.reshape(rows, LANES)
        kernel = functools.partial(
            _rmse_masked_kernel, tm=tm, steps_per_core=steps_per_core,
            tail_block=last_block, n=n_true)
        osq, oct_ = pl.pallas_call(
            kernel,
            out_shape=(acc_shape, acc_shape),
            grid=grid,
            in_specs=[f_spec, f_spec, f_spec],
            out_specs=(acc_spec, acc_spec),
            compiler_params=cparams,
        )(x, t, m)
        # All-false mask -> count 0 -> NaN, matching torch mean-over-empty.
        return jnp.sqrt(jnp.sum(osq) / jnp.sum(oct_))
    else:
        kernel = functools.partial(
            _rmse_nomask_kernel, tm=tm, steps_per_core=steps_per_core,
            tail_block=last_block, n=n_true)
        osq = pl.pallas_call(
            kernel,
            out_shape=acc_shape,
            grid=grid,
            in_specs=[f_spec, f_spec],
            out_specs=acc_spec,
            compiler_params=cparams,
        )(x, t)
        return jnp.sqrt(jnp.sum(osq) / jnp.float32(n_true))   # exact integer count


def _ref_rmse(pred, target, mask=None):
    """Pure-JAX reference mimicking the PyTorch code (boolean fancy-indexing)."""
    if isinstance(pred, dict):
        pred = pred[KEY_OUTPUT]
    x = pred.reshape(-1).astype(jnp.float32)
    t = target.reshape(-1).astype(jnp.float32)
    if mask is not None:
        keep = mask.reshape(-1).astype(bool)
        x = x[keep]
        t = t[keep]
    return jnp.sqrt(jnp.mean((x - t) ** 2))


if __name__ == "__main__":
    key = jax.random.PRNGKey(0)
    k1, k2, k3 = jax.random.split(key, 3)

    B, C, H, W = 2, 1, 16, 16  # depth maps: single channel
    pred = jax.random.uniform(k1, (B, C, H, W), jnp.float32, 0.1, 10.0)
    target = jax.random.uniform(k2, (B, C, H, W), jnp.float32, 0.1, 10.0)
    mask = jax.random.uniform(k3, (B, C, H, W), jnp.float32) > 0.2

    # masked variant (lane-aligned size)
    loss = rmse_loss(pred, target, mask)
    jax.block_until_ready(loss)
    ref = _ref_rmse(pred, target, mask)
    assert jnp.allclose(loss, ref, rtol=1e-4, atol=1e-5), (loss, ref)

    # no-mask variant
    loss_nm = rmse_loss(pred, target, None)
    jax.block_until_ready(loss_nm)
    ref_nm = _ref_rmse(pred, target, None)
    assert jnp.allclose(loss_nm, ref_nm, rtol=1e-4, atol=1e-5), (loss_nm, ref_nm)

    # dict input + non-lane-aligned size (exercises the pad / ragged tail path)
    pred_r = {KEY_OUTPUT: pred[..., :15]}
    target_r = target[..., :15]
    loss_r = rmse_loss(pred_r, target_r, None)
    jax.block_until_ready(loss_r)
    ref_r = _ref_rmse(pred_r, target_r, None)
    assert jnp.allclose(loss_r, ref_r, rtol=1e-4, atol=1e-5), (loss_r, ref_r)

    print("KERNEL_OK")
</pallas_src>

<mosaic_0001>
module attributes {stable_mosaic.version = 11 : i64} {
  func.func @_rmse_masked_kernel(%arg0: i32, %arg1: i32, %arg2: memref<32x128xf32, #tpu.memory_space<vmem>>, %arg3: memref<32x128xf32, #tpu.memory_space<vmem>>, %arg4: memref<32x128xi8, #tpu.memory_space<vmem>>, %arg5: memref<1x8x128xf32, #tpu.memory_space<vmem>>, %arg6: memref<1x8x128xf32, #tpu.memory_space<vmem>>) attributes {dimension_semantics = [#tpu.dimension_semantics<parallel>, #tpu.dimension_semantics<arbitrary>], iteration_bounds = array<i64: 2, 1>, scalar_prefetch = 0 : i64, scratch_operands = 0 : i64, tpu.core_type = #tpu.core_type<tc>, window_params = [{transform_indices = @transform_0, window_bounds = array<i64: 32, 128>}, {transform_indices = @transform_1, window_bounds = array<i64: 32, 128>}, {transform_indices = @transform_2, window_bounds = array<i64: 32, 128>}, {transform_indices = @transform_3, window_bounds = array<i64: 1, 8, 128>}, {transform_indices = @transform_4, window_bounds = array<i64: 1, 8, 128>}]} {
    %c1_i32 = arith.constant 1 : i32
    %0 = arith.muli %arg0, %c1_i32 : i32
    %1 = arith.addi %0, %arg1 : i32
    %c0_i32 = arith.constant 0 : i32
    %2 = arith.cmpi eq, %arg1, %c0_i32 : i32
    %3 = arith.extui %2 : i1 to i32
    %c0_i32_0 = arith.constant 0 : i32
    %4 = arith.cmpi ne, %3, %c0_i32_0 : i32
    scf.if %4 {
      %cst = arith.constant 0.000000e+00 : f32
      %17 = vector.broadcast %cst : f32 to vector<1x8x128xf32>
      %c0_9 = arith.constant 0 : index
      %c0_10 = arith.constant 0 : index
      %c0_11 = arith.constant 0 : index
      %18 = vector.load %arg5[%c0_9, %c0_10, %c0_11] : memref<1x8x128xf32, #tpu.memory_space<vmem>>, vector<1x8x128xf32>
      tpu.vector_store %arg5[%c0_9, %c0_10, %c0_11], %17 {strides = array<i32>} : memref<1x8x128xf32, #tpu.memory_space<vmem>>, vector<1x8x128xf32>,
      %cst_12 = arith.constant 0.000000e+00 : f32
      %19 = vector.broadcast %cst_12 : f32 to vector<1x8x128xf32>
      %c0_13 = arith.constant 0 : index
      %c0_14 = arith.constant 0 : index
      %c0_15 = arith.constant 0 : index
      %20 = vector.load %arg6[%c0_13, %c0_14, %c0_15] : memref<1x8x128xf32, #tpu.memory_space<vmem>>, vector<1x8x128xf32>
      tpu.vector_store %arg6[%c0_13, %c0_14, %c0_15], %19 {strides = array<i32>} : memref<1x8x128xf32, #tpu.memory_space<vmem>>, vector<1x8x128xf32>,
    } else {
    }
    %c0 = arith.constant 0 : index
    %c0_1 = arith.constant 0 : index
    %5 = vector.load %arg2[%c0, %c0_1] : memref<32x128xf32, #tpu.memory_space<vmem>>, vector<32x128xf32>
    %c0_2 = arith.constant 0 : index
    %c0_3 = arith.constant 0 : index
    %6 = vector.load %arg3[%c0_2, %c0_3] : memref<32x128xf32, #tpu.memory_space<vmem>>, vector<32x128xf32>
    %7 = arith.subf %5, %6 : vector<32x128xf32>
    %c0_4 = arith.constant 0 : index
    %c0_5 = arith.constant 0 : index
    %8 = vector.load %arg4[%c0_4, %c0_5] : memref<32x128xi8, #tpu.memory_space<vmem>>, vector<32x128xi8>
    %c0_i8 = arith.constant 0 : i8
    %9 = vector.broadcast %c0_i8 : i8 to vector<32x128xi8>
    %10 = arith.cmpi ne, %8, %9 : vector<32x128xi8>
    %c0_i32_6 = arith.constant 0 : i32
    %11 = arith.cmpi sge, %1, %c0_i32_6 : i32
    %true = arith.constant true
    %12 = arith.xori %11, %true : i1
    %13 = arith.extui %12 : i1 to i32
    %c0_i32_7 = arith.constant 0 : i32
    %14 = arith.cmpi ne, %13, %c0_i32_7 : i32
    scf.if %14 {
      %c0_9 = arith.constant 0 : index
      %c0_10 = arith.constant 0 : index
      %c0_11 = arith.constant 0 : index
      %17 = vector.load %arg5[%c0_9, %c0_10, %c0_11] : memref<1x8x128xf32, #tpu.memory_space<vmem>>, vector<1x8x128xf32>
      %18 = arith.mulf %7, %7 : vector<32x128xf32>
      %cst = arith.constant 0.000000e+00 : f32
      %19 = vector.broadcast %cst : f32 to vector<32x128xf32>
      %20 = arith.select %10, %18, %19 : vector<32x128xi1>, vector<32x128xf32>
      %21 = vector.shape_cast %20 : vector<32x128xf32> to vector<4x8x128xf32>
      %cst_12 = arith.constant dense<0.000000e+00> : vector<8x128xf32>
      %22 = vector.multi_reduction <add>, %21, %cst_12 [0] : vector<4x8x128xf32> to vector<8x128xf32>
      %23 = vector.shape_cast %22 : vector<8x128xf32> to vector<1x8x128xf32>
      %24 = arith.addf %17, %23 : vector<1x8x128xf32>
      %c0_13 = arith.constant 0 : index
      %c0_14 = arith.constant 0 : index
      %c0_15 = arith.constant 0 : index
      %25 = vector.load %arg5[%c0_13, %c0_14, %c0_15] : memref<1x8x128xf32, #tpu.memory_space<vmem>>, vector<1x8x128xf32>
      tpu.vector_store %arg5[%c0_13, %c0_14, %c0_15], %24 {strides = array<i32>} : memref<1x8x128xf32, #tpu.memory_space<vmem>>, vector<1x8x128xf32>,
      %c0_16 = arith.constant 0 : index
      %c0_17 = arith.constant 0 : index
      %c0_18 = arith.constant 0 : index
      %26 = vector.load %arg6[%c0_16, %c0_17, %c0_18] : memref<1x8x128xf32, #tpu.memory_space<vmem>>, vector<1x8x128xf32>
      %27 = arith.extui %10 : vector<32x128xi1> to vector<32x128xi32>
      %28 = arith.sitofp %27 : vector<32x128xi32> to vector<32x128xf32>
      %29 = vector.shape_cast %28 : vector<32x128xf32> to vector<4x8x128xf32>
      %cst_19 = arith.constant dense<0.000000e+00> : vector<8x128xf32>
      %30 = vector.multi_reduction <add>, %29, %cst_19 [0] : vector<4x8x128xf32> to vector<8x128xf32>
      %31 = vector.shape_cast %30 : vector<8x128xf32> to vector<1x8x128xf32>
      %32 = arith.addf %26, %31 : vector<1x8x128xf32>
      %c0_20 = arith.constant 0 : index
      %c0_21 = arith.constant 0 : index
      %c0_22 = arith.constant 0 : index
      %33 = vector.load %arg6[%c0_20, %c0_21, %c0_22] : memref<1x8x128xf32, #tpu.memory_space<vmem>>, vector<1x8x128xf32>
      tpu.vector_store %arg6[%c0_20, %c0_21, %c0_22], %32 {strides = array<i32>} : memref<1x8x128xf32, #tpu.memory_space<vmem>>, vector<1x8x128xf32>,
    } else {
    }
    %15 = arith.extui %11 : i1 to i32
    %c0_i32_8 = arith.constant 0 : i32
    %16 = arith.cmpi ne, %15, %c0_i32_8 : i32
    scf.if %16 {
      %17 = tpu.iota {dimensions = array<i32: 0>} : vector<32x128xi32>
      %18 = tpu.iota {dimensions = array<i32: 1>} : vector<32x128xi32>
      %c32_i32 = arith.constant 32 : i32
      %19 = arith.muli %1, %c32_i32 : i32
      %20 = vector.broadcast %19 : i32 to vector<32x128xi32>
      %21 = arith.addi %20, %17 : vector<32x128xi32>
      %c128_i32 = arith.constant 128 : i32
      %22 = vector.broadcast %c128_i32 : i32 to vector<32x128xi32>
      %23 = arith.muli %21, %22 : vector<32x128xi32>
      %24 = arith.addi %23, %18 : vector<32x128xi32>
      %c512_i32 = arith.constant 512 : i32
      %25 = vector.broadcast %c512_i32 : i32 to vector<32x128xi32>
      %26 = arith.cmpi slt, %24, %25 : vector<32x128xi32>
      %27 = arith.andi %10, %26 : vector<32x128xi1>
      %c0_9 = arith.constant 0 : index
      %c0_10 = arith.constant 0 : index
      %c0_11 = arith.constant 0 : index
      %28 = vector.load %arg5[%c0_9, %c0_10, %c0_11] : memref<1x8x128xf32, #tpu.memory_space<vmem>>, vector<1x8x128xf32>
      %29 = arith.mulf %7, %7 : vector<32x128xf32>
      %cst = arith.constant 0.000000e+00 : f32
      %30 = vector.broadcast %cst : f32 to vector<32x128xf32>
      %31 = arith.select %27, %29, %30 : vector<32x128xi1>, vector<32x128xf32>
      %32 = vector.shape_cast %31 : vector<32x128xf32> to vector<4x8x128xf32>
      %cst_12 = arith.constant dense<0.000000e+00> : vector<8x128xf32>
      %33 = vector.multi_reduction <add>, %32, %cst_12 [0] : vector<4x8x128xf32> to vector<8x128xf32>
      %34 = vector.shape_cast %33 : vector<8x128xf32> to vector<1x8x128xf32>
      %35 = arith.addf %28, %34 : vector<1x8x128xf32>
      %c0_13 = arith.constant 0 : index
      %c0_14 = arith.constant 0 : index
      %c0_15 = arith.constant 0 : index
      %36 = vector.load %arg5[%c0_13, %c0_14, %c0_15] : memref<1x8x128xf32, #tpu.memory_space<vmem>>, vector<1x8x128xf32>
      tpu.vector_store %arg5[%c0_13, %c0_14, %c0_15], %35 {strides = array<i32>} : memref<1x8x128xf32, #tpu.memory_space<vmem>>, vector<1x8x128xf32>,
      %c0_16 = arith.constant 0 : index
      %c0_17 = arith.constant 0 : index
      %c0_18 = arith.constant 0 : index
      %37 = vector.load %arg6[%c0_16, %c0_17, %c0_18] : memref<1x8x128xf32, #tpu.memory_space<vmem>>, vector<1x8x128xf32>
      %38 = arith.extui %27 : vector<32x128xi1> to vector<32x128xi32>
      %39 = arith.sitofp %38 : vector<32x128xi32> to vector<32x128xf32>
      %40 = vector.shape_cast %39 : vector<32x128xf32> to vector<4x8x128xf32>
      %cst_19 = arith.constant dense<0.000000e+00> : vector<8x128xf32>
      %41 = vector.multi_reduction <add>, %40, %cst_19 [0] : vector<4x8x128xf32> to vector<8x128xf32>
      %42 = vector.shape_cast %41 : vector<8x128xf32> to vector<1x8x128xf32>
      %43 = arith.addf %37, %42 : vector<1x8x128xf32>
      %c0_20 = arith.constant 0 : index
      %c0_21 = arith.constant 0 : index
      %c0_22 = arith.constant 0 : index
      %44 = vector.load %arg6[%c0_20, %c0_21, %c0_22] : memref<1x8x128xf32, #tpu.memory_space<vmem>>, vector<1x8x128xf32>
      tpu.vector_store %arg6[%c0_20, %c0_21, %c0_22], %43 {strides = array<i32>} : memref<1x8x128xf32, #tpu.memory_space<vmem>>, vector<1x8x128xf32>,
    } else {
    }
    return
  }
  func.func @transform_0(%arg0: i32, %arg1: i32) -> (i32, i32) {
    %c1_i32 = arith.constant 1 : i32
    %0 = arith.muli %arg0, %c1_i32 : i32
    %1 = arith.addi %0, %arg1 : i32
    %c0_i32 = arith.constant 0 : i32
    %2 = arith.minsi %1, %c0_i32 : i32
    %c0_i32_0 = arith.constant 0 : i32
    %c0_i32_1 = arith.constant 0 : i32
    return %2, %c0_i32_0 : i32, i32
  }
  func.func @transform_1(%arg0: i32, %arg1: i32) -> (i32, i32) {
    %c1_i32 = arith.constant 1 : i32
    %0 = arith.muli %arg0, %c1_i32 : i32
    %1 = arith.addi %0, %arg1 : i32
    %c0_i32 = arith.constant 0 : i32
    %2 = arith.minsi %1, %c0_i32 : i32
    %c0_i32_0 = arith.constant 0 : i32
    %c0_i32_1 = arith.constant 0 : i32
    return %2, %c0_i32_0 : i32, i32
  }
  func.func @transform_2(%arg0: i32, %arg1: i32) -> (i32, i32) {
    %c1_i32 = arith.constant 1 : i32
    %0 = arith.muli %arg0, %c1_i32 : i32
    %1 = arith.addi %0, %arg1 : i32
    %c0_i32 = arith.constant 0 : i32
    %2 = arith.minsi %1, %c0_i32 : i32
    %c0_i32_0 = arith.constant 0 : i32
    %c0_i32_1 = arith.constant 0 : i32
    return %2, %c0_i32_0 : i32, i32
  }
  func.func @transform_3(%arg0: i32, %arg1: i32) -> (i32, i32, i32) {
    %c0_i32 = arith.constant 0 : i32
    %c0_i32_0 = arith.constant 0 : i32
    %c0_i32_1 = arith.constant 0 : i32
    return %arg0, %c0_i32, %c0_i32_0 : i32, i32, i32
  }
  func.func @transform_4(%arg0: i32, %arg1: i32) -> (i32, i32, i32) {
    %c0_i32 = arith.constant 0 : i32
    %c0_i32_0 = arith.constant 0 : i32
    %c0_i32_1 = arith.constant 0 : i32
    return %arg0, %c0_i32, %c0_i32_0 : i32, i32, i32
  }
}

</mosaic_0001>

<bundles_post_ra>
// kernel: tpu_custom_call.1
= control target key start
LH: loop header
LB: loop body
LE: loop exit
PB: predicated region body
PF: predicated region fallthrough
CT: control target
= control target key end

     0   :  { %10 = vsyncpa [#allocation3], 0  ;;  %s1515_s0 = inlined_call_operand.hbm [shape: f32[4,128], index: 0, kind: input, shape index: {}]   ;;  %s1516_s1 = inlined_call_operand.hbm [shape: f32[4,128], index: 1, kind: input, shape index: {}]   ;;  %s1517_s2 = inlined_call_operand.vmem [shape: s8[4,128], index: 2, kind: input, shape index: {}]   ;;  %s1518_s3 = inlined_call_operand.hbm [shape: f32[2,8,128], index: 3, kind: output, shape index: {0}]   ;;  %s1519_s4 = inlined_call_operand.hbm [shape: f32[2,8,128], index: 4, kind: output, shape index: {1}]  }
   0x1   :  { %12 = vsyncpa [#allocation3 + $0x1], 0 }
   0x2   :  { %13 = vsyncpa [#allocation6], 0 }
   0x3   :  { %15 = vsyncpa [#allocation6 + $0x1], 0 }
   0x4   :  { %16 = vsyncpa [#allocation4], 0 }
   0x5   :  { %18 = vsyncpa [#allocation4 + $0x1], 0 }
   0x6   :  { %19 = vsyncpa [#allocation9], 0 }
   0x7   :  { %21 = vsyncpa [#allocation9 + $0x1], 0  ;;  %s1172_s15 = smov 0   ;;  %s1174_s16 = smov 0  }
   0x8   :  { %s1176_s17 = smov 0   ;;  %s1178_s18 = smov 0  }
   0x9   :  { %s1180_s19 = smov 0   ;;  %s1182_s20 = smov 0  }
   0xa   :  { %s1184_s21 = smov 0   ;;  %s1186_s22 = smov 0  }
   0xb LB: > { %s795_s23 = sadd.s32 4294967295, %s1132_s22   ;;  %s796_s24 = sadd.s32 4294967294, %s1132_s22   ;;  %s1132_s22 = sphi %s1186_s22, %s27_s22   ;;  %s1128_s21 = sphi %s1184_s21, %s1543_s21   ;;  %s1124_s20 = sphi %s1182_s20, %s1542_s20   ;;  %s1120_s19 = sphi %s1180_s19, %s1505_s19   ;;  %s1116_s18 = sphi %s1178_s18, %s1541_s18   ;;  %s1112_s17 = sphi %s1176_s17, %s1540_s17   ;;  %s1108_s16 = sphi %s1174_s16, %s1539_s16   ;;  %s1104_s15 = sphi %s1172_s15, %s1538_s15  }
   0xc   : > { %s39_s25 = sadd.s32 1, %s1128_s21  ;;  %p1101_p1 = scmp.ne.s32.totalorder %s1120_s19, 0 }
   0xd   : > { %p41_p0 = scmp.ge.s32.totalorder %s39_s25, 2  ;;  %p60_p2 = scmp.eq.s32.totalorder %s1132_s22, 0 }
   0xe   : > { %p65_p3 = scmp.ne.s32.totalorder %s1120_s19, %s1116_s18  ;;  %p66_p5 = scmp.eq.s32.totalorder %s795_s23, 0 }
   0xf   : > { %s1545_s25 = smov (%p41_p0, %s39_s25), 0  ;;  %p1218_p4 = por %p1101_p1, %p60_p2 }
  0x10   : > { %p1222_p6 = por %p66_p5, %p65_p3  ;;  %s139_s28 = ssub.s32 %s1128_s21, %s1545_s25 }
  0x11   : > { %p140_p7 = scmp.eq.s32.totalorder %s139_s28, 0  ;;  %s142_s29 = sadd.s32 1, %s1112_s17 }
  0x12   : > { %p152_p8 = scmp.ne.s32.totalorder %s1112_s17, %s1108_s16  ;;  %p153_p9 = scmp.eq.s32.totalorder %s795_s23, 1 }
  0x13   : > { %s1230_s30 = scalar_select %p140_p7, %s1112_s17, %s142_s29  }
  0x14   : > { %p158_p10 = scmp.ne.s32.totalorder %s1108_s16, %s1104_s15  ;;  %p159_p11 = scmp.eq.s32.totalorder %s796_s24, 1 }
  0x15   : > { %p1236_p12 = por %p153_p9, %p152_p8  ;;  %p1520_p0 = scmp.ge.s32.totalorder %s1132_s22, 2 }
  0x16   : > { %p1240_p13 = por %p159_p11, %p158_p10 }
  0x17   : > { %201 = sbr.rel (%p1520_p0) target bundleno = 84 (0x54), region = 16 }
  0x1e   : > { %204 = sbr.rel (!%p1218_p4) target bundleno = 57 (0x39), region = 20 }
  0x25   : > { %218 = vsyncadd [#allocation3], 448  ;;  %s1134_s7 = smov [#allocation2]   ;;  %s933_s11 = scalar_lea.hbm %s1515_s0, 64 }
  0x26   : > { %s223_s8 = sshll.u32 %s1134_s7, 4  ;;  %p934_p1 = scmp.ne.s32.totalorder %s1515_s0, %s933_s11  ;;  %s224_s8 = int_to_ptr.vmem [resolvable:$true] %s223_s8 }
  0x27   : > { %p939_p2 = scmp.lt.u32.totalorder %s933_s11, %s933_s11  ;;  %p941_p3 = scmp.lt.u32.totalorder %s933_s11, %s1515_s0 }
  0x29   : > { %p942_p5 = por %p941_p3, %p939_p2 }
  0x2b   : > { %p943_p7 = pnand %p942_p5, %p934_p1 }
  0x2d   : > { %946 = shalt.err (!%p943_p7)
}
  0x2e   : > { %s947_s23 = scalar_lea.vmem %s224_s8, 64  ;;  %s953_s24 = scalar_lea.vmem %s224_s8, 1024 }
  0x2f   : > { %p948_p8 = scmp.ne.s32.totalorder %s224_s8, %s947_s23  ;;  %p954_p9 = scmp.lt.s32.totalorder %s224_s8, %s224_s8 }
  0x30   : > { %p955_p10 = scmp.lt.s32.totalorder %s953_s24, %s947_s23 }
  0x32   : > { %p956_p11 = por %p955_p10, %p954_p9 }
  0x34   : > { %p957_p0 = pnand %p956_p11, %p948_p8 }
  0x36   : > { %960 = shalt.err (!%p957_p0)
}
  0x37   : > { %s1135_s28 = smov 64   ;;  %s1136_s29 = smov 4  }
  0x38   : > { %229 = dma.hbm_to_vmem [thread:$0]  %s1515_s0, 64, %s224_s8, [#allocation3], %s1135_s28, %s1135_s28, %s1136_s29  }
  0x39 PF: > { %232 = sbr.rel (!%p1218_p4) target bundleno = 84 (0x54), region = 24 }
  0x40   : > { %246 = vsyncadd [#allocation6], 448  ;;  %s1137_s10 = smov [#allocation5]   ;;  %s961_s14 = scalar_lea.hbm %s1516_s1, 64 }
  0x41   : > { %s251_s11 = sshll.u32 %s1137_s10, 4  ;;  %p962_p0 = scmp.ne.s32.totalorder %s1516_s1, %s961_s14  ;;  %s252_s11 = int_to_ptr.vmem [resolvable:$true] %s251_s11 }
  0x42   : > { %p967_p1 = scmp.lt.u32.totalorder %s961_s14, %s961_s14  ;;  %p969_p2 = scmp.lt.u32.totalorder %s961_s14, %s1516_s1 }
  0x44   : > { %p970_p3 = por %p969_p2, %p967_p1 }
  0x46   : > { %p971_p5 = pnand %p970_p3, %p962_p0 }
  0x48   : > { %974 = shalt.err (!%p971_p5)
}
  0x49   : > { %s975_s26 = scalar_lea.vmem %s252_s11, 64  ;;  %s981_s8 = scalar_lea.vmem %s252_s11, 1024 }
  0x4a   : > { %p976_p4 = scmp.ne.s32.totalorder %s252_s11, %s975_s26  ;;  %p982_p7 = scmp.lt.s32.totalorder %s252_s11, %s252_s11 }
  0x4b   : > { %p983_p8 = scmp.lt.s32.totalorder %s981_s8, %s975_s26 }
  0x4d   : > { %p984_p9 = por %p983_p8, %p982_p7 }
  0x4f   : > { %p985_p10 = pnand %p984_p9, %p976_p4 }
  0x51   : > { %988 = shalt.err (!%p985_p10)
}
  0x52   : > { %s1138_s28 = smov 64   ;;  %s1139_s29 = smov 4  }
  0x53   : > { %257 = dma.hbm_to_vmem [thread:$0]  %s1516_s1, 64, %s252_s11, [#allocation6], %s1138_s28, %s1138_s28, %s1139_s29  }
  0x54 PF: > { %p813_p11 = scmp.ge.s32.totalorder %s1132_s22, 1  ;;  %p277_p0 = scmp.lt.s32.totalorder %s1132_s22, 3 }
  0x56   : > { %p278_p1 = pnand %p813_p11, %p277_p0 }
  0x57   : > { %s283_s12 = sand.u32 (!%p278_p1), 1, %s1120_s19  }
  0x58   : > { %281 = sbr.rel (%p278_p1) target bundleno = 224 (0xe0), region = 32  ;;  %s814_s13 = sshll.u32 (!%p278_p1), %s283_s12, 5 }
  0x59   : > { %s284_s14 = scalar_lea.sflag (!%p278_p1), [#allocation3], %s283_s12  ;;  %s287_s18 = scalar_lea.vmem (!%p278_p1), [#allocation2], %s814_s13 }
  0x5f   : > { %1082 = dma.done.wait (%p1222_p6), %s284_s14, 512  }
  0x60   : > { %1084 = vsyncadd (%p1222_p6), %s284_s14, 4294966784  ;;  %s293_s11 = scalar_lea.sflag [#allocation6], %s283_s12  ;;  %s296_s23 = scalar_lea.vmem [#allocation5], %s814_s13 }
  0x61   : > { %1086 = dma.done.wait (%p1222_p6), %s293_s11, 512  }
  0x62   : > { %1088 = vsyncadd (%p1222_p6), %s293_s11, 4294966784  ;;  %p353_p2 = scmp.lt.s32.totalorder %s1124_s20, 0  ;;  %s1288_s24 = sand.u32 1, %s1108_s16   ;;  %v1140_v0 = vmov 0.0   ;;  %v376_v1 = vld [vmem:[%s287_s18] sm:$0xff]  ;;  %v377_v2 = vld [vmem:[%s287_s18 + $0x8] sm:$0xff] }
  0x63   : > { %s816_s7 = sshll.u32 %s1288_s24, 3  ;;  %v378_v3 = vld [vmem:[%s287_s18 + $0x10] sm:$0xff]  ;;  %v379_v4 = vld [vmem:[%s287_s18 + $0x18] sm:$0xff]  ;;  %v380_v5 = vld [vmem:[%s296_s23] sm:$0xff]  ;;  %p819_p3 = scmp.ge.s32.totalorder %s1124_s20, 0 }
  0x64   : > { %s354_s26 = scalar_select %p353_p2, %s1124_s20, 0  ;;  %v381_v6 = vld [vmem:[%s296_s23 + $0x8] sm:$0xff]  ;;  %v382_v7 = vld [vmem:[%s296_s23 + $0x10] sm:$0xff]  ;;  %v383_v8 = vld [vmem:[%s296_s23 + $0x18] sm:$0xff]  ;;  %v1303_v9 = vsub.f32 %v376_v1, %v380_v5 }
  0x65   : > { %s1294_s28 = scalar_lea.vmem [#allocation7], %s816_s7  ;;  %s1297_s29 = scalar_lea.vmem [#allocation8], %s816_s7  ;;  %v1305_v10 = vsub.f32 %v377_v2, %v381_v6  ;;  %v1307_v11 = vsub.f32 %v378_v3, %v382_v7  ;;  %v1309_v12 = vsub.f32 %v379_v4, %v383_v8  ;;  %v1141_v24 = vmov (!%p819_p3), 0  }
  0x66   : > { %s818_s8 = sshll.u32 %s354_s26, 3  ;;  %374 = vst [vmem:[%s1294_s28] sm:$0xff] %v1140_v0  ;;  %375 = vst [vmem:[%s1297_s29] sm:$0xff] %v1140_v0  ;;  %v410_v21 = vmul.f32 (!%p819_p3), %v1303_v9, %v1303_v9  ;;  %v1142_v58 = vmov (!%p819_p3), 0.0  }
  0x67   : > { %p358_p6 = scmp.lt.s32.totalorder %s818_s8, 0  ;;  %v411_v22 = vmul.f32 (!%p819_p3), %v1305_v10, %v1305_v10  ;;  %v412_v23 = vmul.f32 (!%p819_p3), %v1307_v11, %v1307_v11  ;;  %v413_v52 = vmul.f32 (!%p819_p3), %v1309_v12, %v1309_v12 }
  0x68   : > { %408 = sbr.rel (%p819_p3) target bundleno = 132 (0x84), region = 48 }
  0x69   : > { %s1547_s8 = smov (!%p358_p6, %s818_s8), 0 }
  0x6a   : > { %s360_s10 = scalar_lea.vmem %s1517_s2, %s1547_s8 }
  0x6b   : > { %v1311_v13 = vld [vmem:[%s360_s10] sm:$0x1]  ;;  %v1313_v14 = vld [vmem:[%s360_s10 + $0x1] sm:$0x1]  ;;  %v1315_v15 = vld [vmem:[%s360_s10 + $0x2] sm:$0x1] }
  0x6c   : > { %v1317_v16 = vld [vmem:[%s360_s10 + $0x3] sm:$0x1]  ;;  %v1319_v17 = vld [vmem:[%s360_s10 + $0x4] sm:$0x1]  ;;  %v1321_v18 = vld [vmem:[%s360_s10 + $0x5] sm:$0x1]  ;;  %vm396_vm0 = vnez %v1311_v13  ;;  %vm397_vm1 = vnez %v1313_v14  ;;  %vm398_vm2 = vnez %v1315_v15 }
  0x6d   : > { %v1326_v19 = vld [vmem:[%s360_s10 + $0x6] sm:$0x1]  ;;  %v1328_v20 = vld [vmem:[%s360_s10 + $0x7] sm:$0x1]  ;;  %vm399_vm3 = vnez %v1317_v16  ;;  %vm1524_vm4 = vnez %v1319_v17  ;;  %vm1523_vm5 = vnez %v1321_v18  ;;  %v414_v25 = vsel (!%p819_p3), %vm396_vm0, 16843009, %v1141_v24 }
  0x6e   : > { %vm1522_vm6 = vnez %v1326_v19  ;;  %vm1521_vm7 = vnez %v1328_v20  ;;  %v415_v26 = vsel (!%p819_p3), %vm397_vm1, 16843009, %v1141_v24  ;;  %v416_v27 = vsel (!%p819_p3), %vm398_vm2, 16843009, %v1141_v24  ;;  %v409_v2 = vld [vmem:[%s1294_s28] sm:$0xff] (!%p819_p3)  ;;  %v463_v5 = vld [vmem:[%s1297_s29] sm:$0xff] (!%p819_p3) }
  0x6f   : > { %v417_v28 = vsel %vm399_vm3, 16843009, %v1141_v24  ;;  %v418_v29 = vsel %vm1524_vm4, 16843009, %v1141_v24  ;;  %v419_v30 = vsel %vm1523_vm5, 16843009, %v1141_v24  ;;  %v422_v31 = vunpack.c.0.s8 %v414_v25 }
  0x70   : > { %v420_v32 = vsel %vm1522_vm6, 16843009, %v1141_v24  ;;  %v421_v33 = vsel %vm1521_vm7, 16843009, %v1141_v24  ;;  %v423_v34 = vunpack.c.0.s8 %v415_v26  ;;  %v424_v35 = vunpack.c.0.s8 %v416_v27 }
  0x71   : > { %v425_v36 = vunpack.c.0.s8 %v417_v28  ;;  %v426_v37 = vunpack.c.0.s8 %v418_v29  ;;  %v427_v38 = vunpack.c.0.s8 %v419_v30  ;;  %v428_v39 = vunpack.c.0.s8 %v420_v32 }
  0x72   : > { %v429_v40 = vunpack.c.0.s8 %v421_v33  ;;  %vm430_vm8 = vcmp.ne.s32.totalorder %v422_v31, 0  ;;  %vm431_vm9 = vcmp.ne.s32.totalorder %v423_v34, 0  ;;  %vm432_vm10 = vcmp.ne.s32.totalorder %v424_v35, 0 }
  0x73   : > { %vm433_vm11 = vcmp.ne.s32.totalorder %v425_v36, 0  ;;  %vm434_vm12 = vcmp.ne.s32.totalorder %v426_v37, 0  ;;  %vm435_vm13 = vcmp.ne.s32.totalorder %v427_v38, 0  ;;  %vm436_vm14 = vcmp.ne.s32.totalorder %v428_v39, 0 }
  0x74   : > { %vm437_vm15 = vcmp.ne.s32.totalorder %v429_v40, 0  ;;  %v438_v41 = vsel %vm430_vm8, 1, %v1141_v24  ;;  %v439_v42 = vsel %vm431_vm9, 1, %v1141_v24  ;;  %v440_v43 = vsel %vm432_vm10, 1, %v1141_v24 }
  0x75   : > { %v441_v44 = vsel %vm433_vm11, 1, %v1141_v24  ;;  %v442_v45 = vsel %vm434_vm12, 1, %v1141_v24  ;;  %v443_v46 = vsel %vm435_vm13, 1, %v1141_v24  ;;  %v444_v47 = vsel %vm436_vm14, 1, %v1141_v24 }
  0x76   : > { %v445_v48 = vsel %vm437_vm15, 1, %v1141_v24  ;;  %v446_v49 = vcombine.low %v438_v41, %v439_v42  ;;  %v447_v50 = vcombine.low %v440_v43, %v441_v44  ;;  %v448_v51 = vcombine.low %v442_v45, %v443_v46 }
  0x77   : > { %v449_v53 = vcombine.low %v444_v47, %v445_v48 }
  0x78   : > { %vm450_vm7 = vcmp.ne.s32.totalorder %v446_v49, 0  ;;  %vm451_vm6 = vcmp.ne.s32.totalorder %v447_v50, 0  ;;  %vm452_vm5 = vcmp.ne.s32.totalorder %v448_v51, 0 }
  0x79   : > { %vm453_vm4 = vcmp.ne.s32.totalorder %v449_v53, 0  ;;  %v454_v54 = vsel %vm450_vm7, %v410_v21, 0.0  ;;  %v455_v55 = vsel %vm451_vm6, %v411_v22, 0.0  ;;  %v456_v56 = vsel %vm452_vm5, %v412_v23, 0.0 }
  0x7a   : > { %v458_v57 = vadd.f32 %v455_v55, %v454_v54  ;;  %v820_v59 = vsel %vm450_vm7, 1.0, %v1142_v58  ;;  %v821_v60 = vsel %vm451_vm6, 1.0, %v1142_v58  ;;  %v457_v61 = vsel %vm453_vm4, %v413_v52, 0.0 }
  0x7b   : > { %v822_v62 = vsel %vm452_vm5, 1.0, %v1142_v58  ;;  %v472_v63 = vadd.f32 %v821_v60, %v820_v59  ;;  %v823_v1 = vsel %vm453_vm4, 1.0, %v1142_v58 }
  0x7c   : > { %v459_v0 = vadd.f32 %v458_v57, %v456_v56 }
  0x7d   : > { %v473_v3 = vadd.f32 %v822_v62, %v472_v63 }
  0x7e   : > { %v460_v4 = vadd.f32 %v459_v0, %v457_v61 }
  0x7f   : > { %v474_v6 = vadd.f32 %v823_v1, %v473_v3 }
  0x80   : > { %v461_v7 = vadd.f32 %v460_v4, %v409_v2 }
  0x81   : > { %v475_v8 = vadd.f32 %v474_v6, %v463_v5 }
  0x82   : > { %462 = vst [vmem:[%s1294_s28] sm:$0xff] %v461_v7 }
  0x83   : > { %476 = vst [vmem:[%s1297_s29] sm:$0xff] %v475_v8 }
  0x84 PF: > { %479 = sbr.rel (%p353_p2) target bundleno = 176 (0xb0), region = 52  ;;  %v480_v21 = vlaneseq (!%p353_p2)  ;;  %s825_s12 = sshll.u32 (!%p353_p2), %s1124_s20, 5  ;;  %v1143_v40 = vmov (!%p353_p2), 0   ;;  %v1372_v46 = vmul.f32 (!%p353_p2), %v1303_v9, %v1303_v9  ;;  %v555_v7 = vmul.f32 (!%p353_p2), %v1305_v10, %v1305_v10 }
  0x85   : > { %v488_v22 = vstv (!%p353_p2), %s825_s12 }
  0x86   : > { %v481_v23 = vshrl.u32 (!%p353_p2), %v480_v21, 7  ;;  %v486_v24 = vand.u32 (!%p353_p2), 127, %v480_v21 }
  0x88   : > { %v482_v25 = vadd.s32 (!%p353_p2), 8, %v481_v23  ;;  %v483_v26 = vadd.s32 (!%p353_p2), 16, %v481_v23  ;;  %v484_v27 = vadd.s32 (!%p353_p2), 24, %v481_v23  ;;  %v489_v28 = vadd.s32 (!%p353_p2), %v488_v22, %v481_v23 }
  0x89   : > { %v556_v23 = vmul.f32 (!%p353_p2), %v1307_v11, %v1307_v11 }
  0x8a   : > { %v490_v29 = vadd.s32 (!%p353_p2), %v488_v22, %v482_v25  ;;  %v491_v30 = vadd.s32 (!%p353_p2), %v488_v22, %v483_v26  ;;  %v492_v31 = vadd.s32 (!%p353_p2), %v488_v22, %v484_v27  ;;  %v493_v32 = vmul.u32 (!%p353_p2), 128, %v489_v28 }
  0x8c   : > { %v494_v33 = vmul.u32 128, %v490_v29  ;;  %v495_v34 = vmul.u32 128, %v491_v30  ;;  %v497_v35 = vadd.s32 %v493_v32, %v486_v24 }
  0x8d   : > { %v496_v36 = vmul.u32 128, %v492_v31 }
  0x8e   : > { %v498_v37 = vadd.s32 %v494_v33, %v486_v24  ;;  %v499_v38 = vadd.s32 %v495_v34, %v486_v24  ;;  %vm501_vm4 = vcmp.lt.s32.totalorder %v497_v35, 512 }
  0x8f   : > { %v500_v39 = vadd.s32 %v496_v36, %v486_v24  ;;  %v505_v41 = vsel %vm501_vm4, 1, %v1143_v40 }
  0x90   : > { %vm502_vm5 = vcmp.lt.s32.totalorder %v498_v37, 512  ;;  %vm503_vm6 = vcmp.lt.s32.totalorder %v499_v38, 512  ;;  %v509_v42 = vcombine.high %v505_v41, %v505_v41  ;;  %v521_v43 = vpack.c.b16 %v505_v41, %v505_v41 }
  0x91   : > { %vm504_vm7 = vcmp.lt.s32.totalorder %v500_v39, 512  ;;  %v506_v44 = vsel %vm502_vm5, 1, %v1143_v40  ;;  %v507_v45 = vsel %vm503_vm6, 1, %v1143_v40  ;;  %v557_v37 = vmul.f32 %v1309_v12, %v1309_v12 }
  0x92   : > { %v508_v47 = vsel %vm504_vm7, 1, %v1143_v40  ;;  %v510_v48 = vcombine.high %v506_v44, %v506_v44  ;;  %v511_v49 = vcombine.high %v507_v45, %v507_v45  ;;  %vm513_vm8 = vcmp.ne.s32.totalorder %v509_v42, 0 }
  0x93   : > { %v512_v50 = vcombine.high %v508_v47, %v508_v47  ;;  %v517_v51 = vsel %vm513_vm8, 1, %v1143_v40  ;;  %v522_v52 = vpack.c.b8 %v521_v43, %v521_v43  ;;  %v525_v53 = vpack.c.b16 %v506_v44, %v506_v44 }
  0x94   : > { %vm514_vm9 = vcmp.ne.s32.totalorder %v510_v48, 0  ;;  %vm515_vm10 = vcmp.ne.s32.totalorder %v511_v49, 0  ;;  %v523_v54 = vpack.c.b16 %v517_v51, %v517_v51  ;;  %v529_v55 = vpack.c.b16 %v507_v45, %v507_v45 }
  0x95   : > { %vm516_vm11 = vcmp.ne.s32.totalorder %v512_v50, 0  ;;  %v518_v56 = vsel %vm514_vm9, 1, %v1143_v40  ;;  %v519_v9 = vsel %vm515_vm10, 1, %v1143_v40  ;;  %v526_v57 = vpack.c.b8 %v525_v53, %v525_v53 }
  0x96   : > { %v520_v58 = vsel %vm516_vm11, 1, %v1143_v40  ;;  %v524_v59 = vpack.c.b8 %v523_v54, %v523_v54  ;;  %v527_v60 = vpack.c.b16 %v518_v56, %v518_v56  ;;  %v530_v61 = vpack.c.b8 %v529_v55, %v529_v55  ;;  %v607_v55 = vld [vmem:[%s1297_s29] sm:$0xff] }
  0x97   : > { %v531_v62 = vpack.c.b16 %v519_v9, %v519_v9  ;;  %v533_v63 = vpack.c.b16 %v508_v47, %v508_v47  ;;  %v535_v0 = vpack.c.b16 %v520_v58, %v520_v58  ;;  %vm537_vm12 = vnez %v522_v52  ;;  %v553_v52 = vld [vmem:[%s1294_s28] sm:$0xff] }
  0x98   : > { %v528_v1 = vpack.c.b8 %v527_v60, %v527_v60  ;;  %vm538_vm13 = vnez %v524_v59  ;;  %vm539_vm14 = vnez %v526_v57  ;;  %vm1379_vm15 = vnez %v530_v61  ;;  %vm545_vm4 = vmand %vm396_vm0, %vm537_vm12 }
  0x99   : > { %v532_v3 = vpack.c.b8 %v531_v62, %v531_v62  ;;  %v534_v4 = vpack.c.b8 %v533_v63, %v533_v63  ;;  %v536_v5 = vpack.c.b8 %v535_v0, %v535_v0  ;;  %vm546_vm5 = vmand %vm397_vm1, %vm538_vm13  ;;  %v558_v6 = vsel %vm545_vm4, 16843009, %v1143_v40 }
  0x9a   : > { %vm540_vm6 = vnez %v528_v1  ;;  %vm547_vm7 = vmand %vm398_vm2, %vm539_vm14  ;;  %v559_v8 = vsel %vm546_vm5, 16843009, %v1143_v40  ;;  %v566_v21 = vunpack.c.0.s8 %v558_v6  ;;  %vm1533_vm2 = vnez %v1319_v17 }
  0x9b   : > { %vm542_vm8 = vnez %v532_v3  ;;  %vm543_vm0 = vnez %v534_v4  ;;  %vm1393_vm9 = vnez %v536_v5  ;;  %vm548_vm1 = vmand %vm399_vm3, %vm540_vm6  ;;  %v560_v14 = vsel %vm547_vm7, 16843009, %v1143_v40 }
  0x9c   : > { %vm549_vm10 = vmand %vm1533_vm2, %vm1379_vm15  ;;  %v561_v10 = vsel %vm548_vm1, 16843009, %v1143_v40  ;;  %v567_v15 = vunpack.c.0.s8 %v559_v8  ;;  %v568_v22 = vunpack.c.0.s8 %v560_v14  ;;  %vm574_vm11 = vcmp.ne.s32.totalorder %v566_v21, 0 }
  0x9d   : > { %vm1534_vm12 = vnez %v1321_v18  ;;  %v562_v16 = vsel %vm549_vm10, 16843009, %v1143_v40  ;;  %v569_v24 = vunpack.c.0.s8 %v561_v10  ;;  %v582_v25 = vsel %vm574_vm11, 1, %v1143_v40 }
  0x9e   : > { %vm550_vm13 = vmand %vm1534_vm12, %vm542_vm8  ;;  %vm1535_vm3 = vnez %v1326_v19  ;;  %v570_v26 = vunpack.c.0.s8 %v562_v16  ;;  %vm575_vm15 = vcmp.ne.s32.totalorder %v567_v15, 0  ;;  %vm576_vm4 = vcmp.ne.s32.totalorder %v568_v22, 0 }
  0x9f   : > { %vm551_vm14 = vmand %vm1535_vm3, %vm543_vm0  ;;  %v563_v17 = vsel %vm550_vm13, 16843009, %v1143_v40  ;;  %vm1536_vm5 = vnez %v1328_v20  ;;  %vm577_vm7 = vcmp.ne.s32.totalorder %v569_v24, 0  ;;  %v583_v27 = vsel %vm575_vm15, 1, %v1143_v40 }
  0xa0   : > { %vm552_vm6 = vmand %vm1536_vm5, %vm1393_vm9  ;;  %v564_v11 = vsel %vm551_vm14, 16843009, %v1143_v40  ;;  %v571_v18 = vunpack.c.0.s8 %v563_v17  ;;  %vm578_vm8 = vcmp.ne.s32.totalorder %v570_v26, 0  ;;  %v584_v29 = vsel %vm576_vm4, 1, %v1143_v40 }
  0xa1   : > { %v565_v28 = vsel %vm552_vm6, 16843009, %v1143_v40  ;;  %v572_v19 = vunpack.c.0.s8 %v564_v11  ;;  %v585_v31 = vsel %vm577_vm7, 1, %v1143_v40  ;;  %v586_v32 = vsel %vm578_vm8, 1, %v1143_v40 }
  0xa2   : > { %v573_v30 = vunpack.c.0.s8 %v565_v28  ;;  %vm579_vm0 = vcmp.ne.s32.totalorder %v571_v18, 0  ;;  %v590_v33 = vcombine.low %v582_v25, %v583_v27  ;;  %v591_v34 = vcombine.low %v584_v29, %v585_v31 }
  0xa3   : > { %vm580_vm1 = vcmp.ne.s32.totalorder %v572_v19, 0  ;;  %v587_v20 = vsel %vm579_vm0, 1, %v1143_v40  ;;  %v1144_v45 = vmov 0.0  }
  0xa4   : > { %vm581_vm9 = vcmp.ne.s32.totalorder %v573_v30, 0  ;;  %v588_v35 = vsel %vm580_vm1, 1, %v1143_v40  ;;  %v592_v36 = vcombine.low %v586_v32, %v587_v20  ;;  %vm594_vm2 = vcmp.ne.s32.totalorder %v590_v33, 0 }
  0xa5   : > { %v589_v38 = vsel %vm581_vm9, 1, %v1143_v40  ;;  %vm595_vm10 = vcmp.ne.s32.totalorder %v591_v34, 0  ;;  %v598_v41 = vsel %vm594_vm2, %v1372_v46, 0.0  ;;  %v826_v47 = vsel %vm594_vm2, 1.0, %v1144_v45 }
  0xa6   : > { %v593_v39 = vcombine.low %v588_v35, %v589_v38  ;;  %vm596_vm11 = vcmp.ne.s32.totalorder %v592_v36, 0  ;;  %v599_v42 = vsel %vm595_vm10, %v555_v7, 0.0  ;;  %v827_v48 = vsel %vm595_vm10, 1.0, %v1144_v45 }
  0xa7   : > { %v600_v43 = vsel %vm596_vm11, %v556_v23, 0.0  ;;  %v602_v44 = vadd.f32 %v599_v42, %v598_v41  ;;  %v828_v12 = vsel %vm596_vm11, 1.0, %v1144_v45  ;;  %v616_v49 = vadd.f32 %v827_v48, %v826_v47 }
  0xa8   : > { %vm597_vm12 = vcmp.ne.s32.totalorder %v593_v39, 0 }
  0xa9   : > { %v601_v40 = vsel %vm597_vm12, %v557_v37, 0.0  ;;  %v603_v50 = vadd.f32 %v602_v44, %v600_v43  ;;  %v829_v51 = vsel %vm597_vm12, 1.0, %v1144_v45  ;;  %v617_v53 = vadd.f32 %v828_v12, %v616_v49 }
  0xab   : > { %v604_v54 = vadd.f32 %v603_v50, %v601_v40  ;;  %v618_v46 = vadd.f32 %v829_v51, %v617_v53 }
  0xad   : > { %v605_v56 = vadd.f32 %v604_v54, %v553_v52  ;;  %v619_v9 = vadd.f32 %v618_v46, %v607_v55 }
  0xaf   : > { %606 = vst [vmem:[%s1294_s28] sm:$0xff] %v605_v56  ;;  %620 = vst [vmem:[%s1297_s29] sm:$0xff] %v619_v9 }
  0xb0 PF: > { %s832_s13 = sshll.u32 %s1124_s20, 7  ;;  %s640_s23 = sshll.u32 %s1294_s28, 4  ;;  %s641_s23 = int_to_ptr.vmem [resolvable:$true] %s640_s23 }
  0xb1   : > { %s1440_s11 = scalar_lea.hbm %s1518_s3, %s832_s13  ;;  %s622_s7 = scalar_lea.sflag [#allocation4], %s1288_s24 }
  0xb2   : > { %s989_s26 = scalar_lea.vmem %s641_s23, 128  ;;  %s1145_s8 = smov [#allocation7]  }
  0xb3   : > { %p990_p5 = scmp.ne.s32.totalorder %s641_s23, %s989_s26  ;;  %s993_s27 = sshll.u32 %s1145_s8, 4  ;;  %s994_s27 = int_to_ptr.vmem [resolvable:$false] %s993_s27 }
  0xb4   : > { %s995_s9 = scalar_lea.vmem %s994_s27, 256  ;;  %p996_p8 = scmp.lt.s32.totalorder %s641_s23, %s994_s27 }
  0xb5   : > { %p991_p4 = pnand %p990_p5, %p1236_p12  ;;  %p997_p9 = scmp.lt.s32.totalorder %s995_s9, %s989_s26 }
  0xb7   : > { %p992_p7 = pneg %p991_p4  ;;  %p998_p10 = por %p997_p9, %p996_p8 }
  0xb9   : > { %p999_p11 = pnand %p998_p10, %p992_p7 }
  0xbb   : > { %1002 = shalt.err (!%p999_p11)
}
  0xbc   : > { %s1003_s28 = scalar_lea.hbm %s1440_s11, 128  ;;  %s1007_s14 = scalar_lea.hbm %s1518_s3, 256 }
  0xbd   : > { %p1004_p0 = scmp.ne.s32.totalorder %s1440_s11, %s1003_s28  ;;  %p1008_p6 = scmp.lt.u32.totalorder %s1440_s11, %s1518_s3 }
  0xbe   : > { %p1009_p3 = scmp.lt.u32.totalorder %s1007_s14, %s1003_s28  ;;  %p1011_p4 = scmp.lt.u32.totalorder %s1003_s28, %s1440_s11 }
  0xbf   : > { %p1005_p1 = pnand %p1004_p0, %p1236_p12 }
  0xc0   : > { %p1010_p5 = por %p1009_p3, %p1008_p6 }
  0xc1   : > { %p1006_p2 = pneg %p1005_p1 }
  0xc2   : > { %p1012_p7 = por %p1011_p4, %p1010_p5 }
  0xc4   : > { %p1013_p8 = pnand %p1012_p7, %p1006_p2 }
  0xc6   : > { %1016 = shalt.err (!%p1013_p8)
}
  0xc7   : > { %840 = dma.vmem_to_hbm [thread:$0]  (%p1236_p12), %s641_s23, 128, %s1440_s11, %s622_s7  }
  0xc8   : > { %s1466_s9 = scalar_lea.hbm %s1519_s4, %s832_s13  ;;  %s653_s10 = sshll.u32 %s1297_s29, 4  ;;  %s654_s10 = int_to_ptr.vmem [resolvable:$true] %s653_s10 }
  0xc9   : > { %s627_s28 = scalar_lea.sflag [#allocation9], %s1288_s24  ;;  %s1017_s12 = scalar_lea.vmem %s654_s10, 128 }
  0xca   : > { %p1018_p9 = scmp.ne.s32.totalorder %s654_s10, %s1017_s12  ;;  %s1146_s14 = smov [#allocation8]  }
  0xcb   : > { %s1021_s18 = sshll.u32 %s1146_s14, 4  ;;  %s1022_s18 = int_to_ptr.vmem [resolvable:$false] %s1021_s18 }
  0xcc   : > { %p1019_p10 = pnand %p1018_p9, %p1236_p12  ;;  %s1023_s8 = scalar_lea.vmem %s1022_s18, 256 }
  0xcd   : > { %p1024_p0 = scmp.lt.s32.totalorder %s654_s10, %s1022_s18  ;;  %p1025_p1 = scmp.lt.s32.totalorder %s1023_s8, %s1017_s12 }
  0xce   : > { %p1020_p11 = pneg %p1019_p10 }
  0xcf   : > { %p1026_p2 = por %p1025_p1, %p1024_p0 }
  0xd1   : > { %p1027_p6 = pnand %p1026_p2, %p1020_p11 }
  0xd3   : > { %1030 = shalt.err (!%p1027_p6)
}
  0xd4   : > { %s1031_s20 = scalar_lea.hbm %s1466_s9, 128  ;;  %s1035_s13 = scalar_lea.hbm %s1519_s4, 256 }
  0xd5   : > { %p1032_p3 = scmp.ne.s32.totalorder %s1466_s9, %s1031_s20  ;;  %p1036_p7 = scmp.lt.u32.totalorder %s1466_s9, %s1519_s4 }
  0xd6   : > { %p1037_p8 = scmp.lt.u32.totalorder %s1035_s13, %s1031_s20  ;;  %p1039_p10 = scmp.lt.u32.totalorder %s1031_s20, %s1466_s9 }
  0xd7   : > { %p1033_p5 = pnand %p1032_p3, %p1236_p12 }
  0xd8   : > { %p1038_p9 = por %p1037_p8, %p1036_p7 }
  0xd9   : > { %p1034_p4 = pneg %p1033_p5 }
  0xda   : > { %p1040_p11 = por %p1039_p10, %p1038_p9 }
  0xdc   : > { %p1041_p0 = pnand %p1040_p11, %p1034_p4 }
  0xde   : > { %1044 = shalt.err (!%p1041_p0)
}
  0xdf   : > { %841 = dma.vmem_to_hbm [thread:$0]  (%p1236_p12), %s654_s10, 128, %s1466_s9, %s627_s28  }
  0xe0 PF: > { %s665_s7 = sand.u32 1, %s1104_s15   ;;  %p1537_p1 = scmp.ge.s32.totalorder %s1132_s22, 2 }
  0xe1   : > { %s666_s26 = scalar_lea.sflag [#allocation4], %s665_s7 }
  0xe2   : > { %p845_p2 = pnand %p1537_p1, %p1240_p13 }
  0xe4   : > { %1090 = dma.done.wait (!%p845_p2), %s666_s26, 128  }
  0xe5   : > { %1092 = vsyncadd (!%p845_p2), %s666_s26, 4294967168  ;;  %s675_s27 = scalar_lea.sflag [#allocation9], %s665_s7 }
  0xe6   : > { %1094 = dma.done.wait (!%p845_p2), %s675_s27, 128  }
  0xe7   : > { %1096 = vsyncadd (!%p845_p2), %s675_s27, 4294967168  ;;  %s27_s22 = sadd.s32 1, %s1132_s22   ;;  %s1538_s15 = smov %s1108_s16 }
  0xe8   : > { %p24_p6 = scmp.ge.s32.totalorder %s27_s22, 4   ;;  %s1539_s16 = smov %s1112_s17 }
  0xe9   : > { %s1540_s17 = smov %s1230_s30  ;;  %s1541_s18 = smov %s1120_s19 }
  0xea   : > { %s1505_s19 = smov 0   ;;  %s1542_s20 = smov %s1128_s21 }
  0xeb   : > { %s1543_s21 = smov %s1545_s25  ;;  %26 = sbr.rel (!%p24_p6) target bundleno = 11 (0xb), region = 122 }
  0xf2   :  { %680 = vsyncpa [#allocation3], 1 }
  0xf3   :  { %682 = vsyncpa [#allocation3 + $0x1], 1 }
  0xf4   :  { %683 = vsyncpa [#allocation6], 1 }
  0xf5   :  { %685 = vsyncpa [#allocation6 + $0x1], 1 }
  0xf6   :  { %686 = vsyncpa [#allocation4], 1 }
  0xf7   :  { %688 = vsyncpa [#allocation4 + $0x1], 1 }
  0xf8   :  { %689 = vsyncpa [#allocation9], 1 }
  0xf9   :  { %691 = vsyncpa [#allocation9 + $0x1], 1 }

</bundles_post_ra>
